<compile_context>
chip_gen: v7x
topology: tpu7x:2x2x1
jax: 0.10.0
libtpu: 0.0.40
codegen_flags: <defaults>
</compile_context>

<pallas_src>
import functools

import jax
import jax.numpy as jnp
from jax.experimental import pallas as pl
from jax.experimental.pallas import tpu as pltpu


def _round_up(x: int, m: int) -> int:
    return ((x + m - 1) // m) * m


def _linear_bias_kernel(x_ref, w_ref, b_ref, o_ref, acc_ref):
    k = pl.program_id(2)

    @pl.when(k == 0)
    def _():
        acc_ref[...] = jnp.zeros_like(acc_ref)

    acc_ref[...] += jnp.dot(
        x_ref[...], w_ref[...], preferred_element_type=jnp.float32
    )

    @pl.when(k == pl.num_programs(2) - 1)
    def _():
        # Bias added once per output tile, on the f32 accumulator.
        o_ref[...] = (acc_ref[...] + b_ref[...].astype(jnp.float32)).astype(o_ref.dtype)


def _linear_nobias_kernel(x_ref, w_ref, o_ref, acc_ref):
    k = pl.program_id(2)

    @pl.when(k == 0)
    def _():
        acc_ref[...] = jnp.zeros_like(acc_ref)

    acc_ref[...] += jnp.dot(
        x_ref[...], w_ref[...], preferred_element_type=jnp.float32
    )

    @pl.when(k == pl.num_programs(2) - 1)
    def _():
        o_ref[...] = acc_ref[...].astype(o_ref.dtype)


def linear_forward(x, weight, bias=None, *, tm_target=256, tn_target=256, tk_target=512):
    """Pallas equivalent of Linear.forward: x @ weight (+ bias)."""
    in_features, out_features = weight.shape
    lead_shape = x.shape[:-1]
    m = 1
    for d in lead_shape:
        m *= d

    dtype = x.dtype
    weight = weight.astype(dtype)
    x2d = x.reshape(m, in_features)

    # --- Pad to TPU-friendly shapes (zeros are mathematically inert here). ---
    # f32 sublane multiple = 8; lane multiple = 128 (lane-dense output).
    m_pad = _round_up(max(m, 1), 8)
    tm = min(tm_target, m_pad)
    m_pad = _round_up(m_pad, tm)

    k_pad = _round_up(in_features, 8)
    tk = min(tk_target, k_pad)
    k_pad = _round_up(k_pad, tk)

    n_pad = _round_up(out_features, 128)
    tn = min(tn_target, n_pad)
    n_pad = _round_up(n_pad, tn)

    if (m_pad != m) or (k_pad != in_features):
        x2d = jnp.pad(x2d, ((0, m_pad - m), (0, k_pad - in_features)))
    if (k_pad != in_features) or (n_pad != out_features):
        weight = jnp.pad(weight, ((0, k_pad - in_features), (0, n_pad - out_features)))

    grid = (m_pad // tm, n_pad // tn, k_pad // tk)

    out_shape = jax.ShapeDtypeStruct((m_pad, n_pad), dtype)
    itemsize = jnp.dtype(dtype).itemsize
    cost = pl.CostEstimate(
        flops=2 * m_pad * n_pad * k_pad,
        bytes_accessed=(m_pad * k_pad + k_pad * n_pad + m_pad * n_pad) * itemsize,
        transcendentals=0,
    )
    compiler_params = pltpu.CompilerParams(
        dimension_semantics=("parallel", "parallel", "arbitrary")
    )

    x_spec = pl.BlockSpec((tm, tk), lambda i, j, k: (i, k))
    w_spec = pl.BlockSpec((tk, tn), lambda i, j, k: (k, j))
    o_spec = pl.BlockSpec((tm, tn), lambda i, j, k: (i, j))
    scratch = [pltpu.VMEM((tm, tn), jnp.float32)]

    if bias is not None:
        bias = bias.astype(dtype).reshape(1, out_features)
        if n_pad != out_features:
            bias = jnp.pad(bias, ((0, 0), (0, n_pad - out_features)))
        b_spec = pl.BlockSpec((1, tn), lambda i, j, k: (0, j))
        out2d = pl.pallas_call(
            _linear_bias_kernel,
            out_shape=out_shape,
            grid_spec=pltpu.PrefetchScalarGridSpec(
                num_scalar_prefetch=0,
                grid=grid,
                in_specs=[x_spec, w_spec, b_spec],
                out_specs=o_spec,
                scratch_shapes=scratch,
            ),
            compiler_params=compiler_params,
            cost_estimate=cost,
        )(x2d, weight, bias)
    else:
        out2d = pl.pallas_call(
            _linear_nobias_kernel,
            out_shape=out_shape,
            grid_spec=pltpu.PrefetchScalarGridSpec(
                num_scalar_prefetch=0,
                grid=grid,
                in_specs=[x_spec, w_spec],
                out_specs=o_spec,
                scratch_shapes=scratch,
            ),
            compiler_params=compiler_params,
            cost_estimate=cost,
        )(x2d, weight)

    out2d = out2d[:m, :out_features]
    return out2d.reshape(*lead_shape, out_features)


def make_linear_params(key, in_features, out_features, bias=False, dtype=jnp.float32):
    """Deterministic init mirroring: (-1-1)*rand(shape) + 1  == -2*U[0,1) + 1."""
    kw, kb = jax.random.split(key)
    weight = -2.0 * jax.random.uniform(kw, (in_features, out_features), dtype) + 1.0
    if bias:
        b = -2.0 * jax.random.uniform(kb, (1, out_features), dtype) + 1.0
    else:
        b = None
    return weight, b


if __name__ == "__main__":
    key = jax.random.PRNGKey(0)
    k_param, k_x = jax.random.split(key)

    in_features, out_features = 32, 64
    batch, seq = 2, 8  # small leading dims, broadcast like torch.matmul

    weight, bias = make_linear_params(k_param, in_features, out_features, bias=True)
    x = jax.random.normal(k_x, (batch, seq, in_features), dtype=jnp.float32)

    fwd = jax.jit(functools.partial(linear_forward))
    out = fwd(x, weight, bias)
    out = jax.block_until_ready(out)

    # Sanity checks against plain JAX reference (with and without bias).
    ref = x @ weight + bias
    assert out.shape == (batch, seq, out_features)
    assert jnp.allclose(out, ref, atol=1e-5, rtol=1e-5)

    out_nb = jax.block_until_ready(linear_forward(x, weight, None))
    assert jnp.allclose(out_nb, x @ weight, atol=1e-5, rtol=1e-5)

    print("KERNEL_OK")
</pallas_src>

<mosaic_0001>
module attributes {stable_mosaic.version = 11 : i64} {
  func.func @_linear_bias_kernel(%arg0: i32, %arg1: i32, %arg2: i32, %arg3: memref<16x32xf32, #tpu.memory_space<vmem>>, %arg4: memref<32x128xf32, #tpu.memory_space<vmem>>, %arg5: memref<1x128xf32, #tpu.memory_space<vmem>>, %arg6: memref<16x128xf32, #tpu.memory_space<vmem>>, %arg7: memref<16x128xf32, #tpu.memory_space<vmem>>) attributes {dimension_semantics = [#tpu.dimension_semantics<parallel>, #tpu.dimension_semantics<parallel>, #tpu.dimension_semantics<arbitrary>], iteration_bounds = array<i64: 1, 1, 1>, scalar_prefetch = 0 : i64, scratch_operands = 1 : i64, tpu.core_type = #tpu.core_type<tc>, window_params = [{transform_indices = @transform_0, window_bounds = array<i64: 16, 32>}, {transform_indices = @transform_1, window_bounds = array<i64: 32, 128>}, {transform_indices = @transform_2, window_bounds = array<i64: 1, 128>}, {transform_indices = @transform_3, window_bounds = array<i64: 16, 128>}]} {
    %c0_i32 = arith.constant 0 : i32
    %0 = arith.cmpi eq, %arg2, %c0_i32 : i32
    %1 = arith.extui %0 : i1 to i32
    %c0_i32_0 = arith.constant 0 : i32
    %2 = arith.cmpi ne, %1, %c0_i32_0 : i32
    scf.if %2 {
      %cst_10 = arith.constant 0.000000e+00 : f32
      %12 = vector.broadcast %cst_10 : f32 to vector<16x128xf32>
      %c0_11 = arith.constant 0 : index
      %c0_12 = arith.constant 0 : index
      %13 = vector.load %arg7[%c0_11, %c0_12] : memref<16x128xf32, #tpu.memory_space<vmem>>, vector<16x128xf32>
      tpu.vector_store %arg7[%c0_11, %c0_12], %12 {strides = array<i32>} : memref<16x128xf32, #tpu.memory_space<vmem>>, vector<16x128xf32>,
    } else {
    }
    %c0 = arith.constant 0 : index
    %c0_1 = arith.constant 0 : index
    %3 = vector.load %arg7[%c0, %c0_1] : memref<16x128xf32, #tpu.memory_space<vmem>>, vector<16x128xf32>
    %c0_2 = arith.constant 0 : index
    %c0_3 = arith.constant 0 : index
    %4 = vector.load %arg3[%c0_2, %c0_3] : memref<16x32xf32, #tpu.memory_space<vmem>>, vector<16x32xf32>
    %c0_4 = arith.constant 0 : index
    %c0_5 = arith.constant 0 : index
    %5 = vector.load %arg4[%c0_4, %c0_5] : memref<32x128xf32, #tpu.memory_space<vmem>>, vector<32x128xf32>
    %cst = arith.constant dense<0.000000e+00> : vector<16x128xf32>
    %6 = tpu.matmul %4, %5, %cst {dimension_numbers = #tpu.dot_dimension_numbers<[1], [0], [0], [1], [0, 0, 1, 1], [], []>} : vector<16x32xf32>, vector<32x128xf32>, vector<16x128xf32> -> vector<16x128xf32>
    %7 = arith.addf %3, %6 : vector<16x128xf32>
    %c0_6 = arith.constant 0 : index
    %c0_7 = arith.constant 0 : index
    %8 = vector.load %arg7[%c0_6, %c0_7] : memref<16x128xf32, #tpu.memory_space<vmem>>, vector<16x128xf32>
    tpu.vector_store %arg7[%c0_6, %c0_7], %7 {strides = array<i32>} : memref<16x128xf32, #tpu.memory_space<vmem>>, vector<16x128xf32>,
    %c0_i32_8 = arith.constant 0 : i32
    %9 = arith.cmpi eq, %arg2, %c0_i32_8 : i32
    %10 = arith.extui %9 : i1 to i32
    %c0_i32_9 = arith.constant 0 : i32
    %11 = arith.cmpi ne, %10, %c0_i32_9 : i32
    scf.if %11 {
      %c0_10 = arith.constant 0 : index
      %c0_11 = arith.constant 0 : index
      %12 = vector.load %arg7[%c0_10, %c0_11] : memref<16x128xf32, #tpu.memory_space<vmem>>, vector<16x128xf32>
      %c0_12 = arith.constant 0 : index
      %c0_13 = arith.constant 0 : index
      %13 = vector.load %arg5[%c0_12, %c0_13] : memref<1x128xf32, #tpu.memory_space<vmem>>, vector<1x128xf32>
      %14 = vector.broadcast %13 : vector<1x128xf32> to vector<16x128xf32>
      %15 = arith.addf %12, %14 : vector<16x128xf32>
      %c0_14 = arith.constant 0 : index
      %c0_15 = arith.constant 0 : index
      %16 = vector.load %arg6[%c0_14, %c0_15] : memref<16x128xf32, #tpu.memory_space<vmem>>, vector<16x128xf32>
      tpu.vector_store %arg6[%c0_14, %c0_15], %15 {strides = array<i32>} : memref<16x128xf32, #tpu.memory_space<vmem>>, vector<16x128xf32>,
    } else {
    }
    return
  }
  func.func @transform_0(%arg0: i32, %arg1: i32, %arg2: i32) -> (i32, i32) {
    %c0_i32 = arith.constant 0 : i32
    return %arg0, %arg2 : i32, i32
  }
  func.func @transform_1(%arg0: i32, %arg1: i32, %arg2: i32) -> (i32, i32) {
    %c0_i32 = arith.constant 0 : i32
    return %arg2, %arg1 : i32, i32
  }
  func.func @transform_2(%arg0: i32, %arg1: i32, %arg2: i32) -> (i32, i32) {
    %c0_i32 = arith.constant 0 : i32
    %c0_i32_0 = arith.constant 0 : i32
    return %c0_i32, %arg1 : i32, i32
  }
  func.func @transform_3(%arg0: i32, %arg1: i32, %arg2: i32) -> (i32, i32) {
    %c0_i32 = arith.constant 0 : i32
    return %arg0, %arg1 : i32, i32
  }
}

</mosaic_0001>

<bundles_post_ra>
// kernel: linear_forward.1
= control target key start
LH: loop header
LB: loop body
LE: loop exit
PB: predicated region body
PF: predicated region fallthrough
CT: control target
= control target key end

     0   :  { %vm28_vm0 = vcmask 261120   ;;  %s209_s1 = inlined_call_operand.vmem [shape: f32[32,128], index: 1, kind: input, shape index: {}]   ;;  %s210_s0 = inlined_call_operand.vmem [shape: f32[16,32], index: 0, kind: input, shape index: {}]   ;;  %s211_s2 = inlined_call_operand.vmem [shape: f32[1,128], index: 2, kind: input, shape index: {}]   ;;  %s212_s3 = inlined_call_operand.vmem [shape: f32[16,128], index: 3, kind: output, shape index: {}]  }
   0x1   :  { %v24_v0 = vld [vmem:[%s209_s1] sm:$0xff]  ;;  %v25_v1 = vld [vmem:[%s209_s1 + $0x8] sm:$0xff]  ;;  %v26_v2 = vld [vmem:[%s209_s1 + $0x10] sm:$0xff] }
   0x2   :  { %v154_v3 = vpack.c.bf16 %v25_v1, %v24_v0  ;;  %v27_v4 = vld [vmem:[%s209_s1 + $0x18] sm:$0xff]  ;;  %v22_v5 = vld [vmem:[%s210_s0] sm:$0xff]  ;;  %v23_v7 = vld [vmem:[%s210_s0 + $0x8] sm:$0xff] }
   0x3   :  { %v158_v6 = vpack.c.bf16 %v27_v4, %v26_v2  ;;  %151 = vmatprep.mubr.msk.f32.mxu0 %vm28_vm0, %v22_v5  ;;  %v136_v8 = vld [vmem:[%s211_s2] ss:$0 sm:$0xff] }
   0x4   :  { %155 = vmatprep.subr.bf16.mxu0 %v154_v3 }
   0x5   :  { %157 = vmatpush3.bf16.msra.mxu0 %v154_v3 }
   0x6   :  { %159 = vmatprep.subr.bf16.mxu0 %v158_v6 }
   0x9   :  { %161 = vmatpush3.bf16.msra.mxu0 %v158_v6 }
   0xc   :  { %152 = vmatmul.mubr.msk.f32.vlgmr.msra.gmra.mrb[0].mxu0 %vm28_vm0, %v23_v7 }
  0xdf   :  { %v153_v9 = vpop.f32.mrb[0].mxu0 }
  0xe0   :  { %v127_v10 = vadd.f32 %v153_v9, %v136_v8  ;;  %v101_v11 = vpop.f32.mrb[1].mxu0 }
  0xe1   :  { %v126_v12 = vadd.f32 %v136_v8, %v101_v11 }
  0xe2   :  { %129 = vst [vmem:[%s212_s3 + $0x8] sm:$0xff] %v127_v10 }
  0xe3   :  { %128 = vst [vmem:[%s212_s3] sm:$0xff] %v126_v12 }

</bundles_post_ra>
